<compile_context>
chip_gen: v7x
topology: tpu7x:2x2x1
jax: 0.10.0
libtpu: 0.0.40
codegen_flags: <defaults>
</compile_context>

<pallas_src>
import functools

import jax
import jax.numpy as jnp
from jax import lax
from jax.experimental import pallas as pl
from jax.experimental.pallas import tpu as pltpu

# v7x-safe scoped-VMEM budget (64 MiB physical on v7x; 128 MiB on v5e/v6e).
_VMEM_LIMIT = 48 * 1024 * 1024


def _round_up(x, m):
    return ((x + m - 1) // m) * m


# --------------------------------------------------------------------------
# Kernel 1: hoisted input projection  G = X @ [W_ih_f | W_ih_b] + b
# --------------------------------------------------------------------------
def _proj_kernel(x_ref, w_ref, b_ref, g_ref):
    g_ref[...] = (jnp.dot(x_ref[...], w_ref[...],
                          preferred_element_type=jnp.float32)
                  + b_ref[...]).astype(g_ref.dtype)


def input_projection(x_flat, w, b, *, max_rows=512):
    """x_flat: (R, D) bf16, w: (D, G) bf16, b: (1, G) f32 -> (R, G) f32."""
    R, D = x_flat.shape
    G = w.shape[1]
    rt = min(max_rows, R)
    Rp = _round_up(R, rt)
    x_p = jnp.pad(x_flat, ((0, Rp - R), (0, 0))) if Rp != R else x_flat
    out = pl.pallas_call(
        _proj_kernel,
        out_shape=jax.ShapeDtypeStruct((Rp, G), jnp.float32),
        grid=(Rp // rt,),
        in_specs=[
            pl.BlockSpec((rt, D), lambda i: (i, 0)),
            pl.BlockSpec((D, G), lambda i: (0, 0)),   # weights stay resident
            pl.BlockSpec((1, G), lambda i: (0, 0)),
        ],
        out_specs=pl.BlockSpec((rt, G), lambda i: (i, 0)),
        compiler_params=pltpu.CompilerParams(
            dimension_semantics=("parallel",),
            vmem_limit_bytes=_VMEM_LIMIT),
    )(x_p, w, b)
    return out if Rp == R else out[:R]


# --------------------------------------------------------------------------
# Kernel 2: fused bidirectional recurrence over precomputed gates
# --------------------------------------------------------------------------
def _lstm_cell(g_pre, h_prev, c_prev, w_hh, H):
    """One LSTM cell update given precomputed input-projection gates (B, 4H)."""
    g = g_pre + jnp.dot(h_prev.astype(w_hh.dtype), w_hh,
                        preferred_element_type=jnp.float32)
    i_g = jax.nn.sigmoid(g[:, 0 * H:1 * H])
    f_g = jax.nn.sigmoid(g[:, 1 * H:2 * H])
    g_g = jnp.tanh(g[:, 2 * H:3 * H])
    o_g = jax.nn.sigmoid(g[:, 3 * H:4 * H])
    c_new = f_g * c_prev + i_g * g_g
    h_new = o_g * jnp.tanh(c_new)
    return h_new, c_new


def _run_bilstm(g_ref, whhf_ref, whhb_ref, hf, cf, hb, cb, H,
                out_ref=None, hb_last=None):
    T = g_ref.shape[0]
    hf[...] = jnp.zeros_like(hf)
    cf[...] = jnp.zeros_like(cf)
    hb[...] = jnp.zeros_like(hb)
    cb[...] = jnp.zeros_like(cb)
    w_f = whhf_ref[...]       # hoisted out of the loop
    w_b = whhb_ref[...]

    def step(t, carry):
        # forward direction, original time t
        g_f = g_ref[t, :, pl.ds(0, 4 * H)]               # (B, 4H) f32
        hfn, cfn = _lstm_cell(g_f, hf[...], cf[...], w_f, H)
        hf[...] = hfn
        cf[...] = cfn
        # backward direction, original time T-1-t (reversed indexing, no flip)
        tr = T - 1 - t
        g_b = g_ref[tr, :, pl.ds(4 * H, 4 * H)]          # (B, 4H) f32
        hbn, cbn = _lstm_cell(g_b, hb[...], cb[...], w_b, H)
        hb[...] = hbn
        cb[...] = cbn
        if out_ref is not None:
            out_ref[t, :, pl.ds(0, H)] = hfn.astype(out_ref.dtype)
            out_ref[tr, :, pl.ds(H, H)] = hbn.astype(out_ref.dtype)
        if hb_last is not None:
            @pl.when(t == 0)
            def _():
                hb_last[...] = hbn    # backward hidden at original time T-1
        return carry

    # unroll=2 lets the scheduler overlap the two directions' independent
    # MXU matmuls with the previous step's gate nonlinearities (VPU/EUP).
    lax.fori_loop(0, T, step, 0, unroll=2)


def _bilstm_seq_kernel(g_ref, whhf_ref, whhb_ref, out_ref,
                       hf, cf, hb, cb, *, hidden):
    _run_bilstm(g_ref, whhf_ref, whhb_ref, hf, cf, hb, cb, hidden,
                out_ref=out_ref)


def _bilstm_fc_kernel(g_ref, whhf_ref, whhb_ref, wfc_ref, bfc_ref,
                      logits_ref, hf, cf, hb, cb, hb_last, *, hidden):
    H = hidden
    _run_bilstm(g_ref, whhf_ref, whhb_ref, hf, cf, hb, cb, H,
                hb_last=hb_last)
    # Fused FC on out[:, -1, :] = [h_fwd(T-1), h_bwd(T-1)]; data is already
    # in VMEM, no sequence writeback needed for the last layer.
    logits = (jnp.dot(hf[...], wfc_ref[0:H, :],
                      preferred_element_type=jnp.float32)
              + jnp.dot(hb_last[...], wfc_ref[H:2 * H, :],
                        preferred_element_type=jnp.float32)
              + bfc_ref[...])
    logits_ref[...] = logits.astype(logits_ref.dtype)


def bilstm_recurrence_seq(gates, w_hh_f, w_hh_b, hidden):
    # TODO(synk): for very long sequences, stream the gate tensor through VMEM
    # in time chunks (grid over T, 'arbitrary', carried h/c scratch and a
    # two-pass direction axis) instead of keeping (T, B, 8H) resident.
    T, B, _ = gates.shape
    H = hidden
    kernel = functools.partial(_bilstm_seq_kernel, hidden=H)
    return pl.pallas_call(
        kernel,
        out_shape=jax.ShapeDtypeStruct((T, B, 2 * H), jnp.bfloat16),
        grid=(1,),
        in_specs=[
            pl.BlockSpec((T, B, 8 * H), lambda i: (0, 0, 0)),
            pl.BlockSpec((H, 4 * H), lambda i: (0, 0)),
            pl.BlockSpec((H, 4 * H), lambda i: (0, 0)),
        ],
        out_specs=pl.BlockSpec((T, B, 2 * H), lambda i: (0, 0, 0)),
        scratch_shapes=[pltpu.VMEM((B, H), jnp.float32)] * 4,  # h_f, c_f, h_b, c_b
        compiler_params=pltpu.CompilerParams(
            dimension_semantics=("arbitrary",),
            vmem_limit_bytes=_VMEM_LIMIT),
    )(gates, w_hh_f, w_hh_b)


def bilstm_recurrence_fc(gates, w_hh_f, w_hh_b, w_fc, b_fc, hidden,
                         num_classes):
    T, B, _ = gates.shape
    H = hidden
    kernel = functools.partial(_bilstm_fc_kernel, hidden=H)
    return pl.pallas_call(
        kernel,
        out_shape=jax.ShapeDtypeStruct((B, num_classes), jnp.float32),
        grid=(1,),
        in_specs=[
            pl.BlockSpec((T, B, 8 * H), lambda i: (0, 0, 0)),
            pl.BlockSpec((H, 4 * H), lambda i: (0, 0)),
            pl.BlockSpec((H, 4 * H), lambda i: (0, 0)),
            pl.BlockSpec((2 * H, num_classes), lambda i: (0, 0)),
            pl.BlockSpec((1, num_classes), lambda i: (0, 0)),
        ],
        out_specs=pl.BlockSpec((B, num_classes), lambda i: (0, 0)),
        scratch_shapes=[pltpu.VMEM((B, H), jnp.float32)] * 5,  # +hb_last
        compiler_params=pltpu.CompilerParams(
            dimension_semantics=("arbitrary",),
            vmem_limit_bytes=_VMEM_LIMIT),
    )(gates, w_hh_f, w_hh_b, w_fc, b_fc)


# --------------------------------------------------------------------------
# Parameter init (PyTorch-style uniform(-1/sqrt(H), 1/sqrt(H)))
# --------------------------------------------------------------------------
def init_params(key, input_size, hidden_size, num_layers, num_classes):
    H = hidden_size
    k_lstm = 1.0 / (H ** 0.5)
    params = {"lstm": []}
    for layer in range(num_layers):
        d_in = input_size if layer == 0 else 2 * H
        w_ih_dirs, w_hh_dirs, b_dirs = [], [], []
        for _direction in range(2):              # forward, backward
            key, k1, k2, k3, k4 = jax.random.split(key, 5)
            w_ih = jax.random.uniform(k1, (d_in, 4 * H), jnp.float32,
                                      -k_lstm, k_lstm)
            w_hh = jax.random.uniform(k2, (H, 4 * H), jnp.float32,
                                      -k_lstm, k_lstm)
            b_ih = jax.random.uniform(k3, (4 * H,), jnp.float32,
                                      -k_lstm, k_lstm)
            b_hh = jax.random.uniform(k4, (4 * H,), jnp.float32,
                                      -k_lstm, k_lstm)
            w_ih_dirs.append(w_ih)
            w_hh_dirs.append(w_hh)
            b_dirs.append(b_ih + b_hh)
        params["lstm"].append({
            "w_ih": jnp.concatenate(w_ih_dirs, axis=1).astype(jnp.bfloat16),
            "b": jnp.concatenate(b_dirs)[None, :],            # (1, 8H) f32
            "w_hh_f": w_hh_dirs[0].astype(jnp.bfloat16),
            "w_hh_b": w_hh_dirs[1].astype(jnp.bfloat16),
        })

    key, k1, k2 = jax.random.split(key, 3)
    k_fc = 1.0 / ((2 * H) ** 0.5)
    w_fc = jax.random.uniform(k1, (2 * H, num_classes), jnp.float32,
                              -k_fc, k_fc)
    b_fc = jax.random.uniform(k2, (1, num_classes), jnp.float32,
                              -k_fc, k_fc)
    params["fc"] = (w_fc, b_fc)
    return params


# --------------------------------------------------------------------------
# Full forward pass (matches BiLSTM.forward with zero initial h0/c0)
# --------------------------------------------------------------------------
def bilstm_forward(x, params, hidden_size, num_layers, num_classes):
    B0, T, _ = x.shape
    H = hidden_size
    Bp = max(8, _round_up(B0, 8))        # fill at least a full f32 sublane tile
    if Bp != B0:
        x = jnp.pad(x, ((0, Bp - B0), (0, 0), (0, 0)))
    layer_in = jnp.transpose(x, (1, 0, 2)).astype(jnp.bfloat16)  # (T, Bp, D)

    logits = None
    for layer in range(num_layers):
        p = params["lstm"][layer]
        T_, B_, D_ = layer_in.shape
        gates = input_projection(layer_in.reshape(T_ * B_, D_),
                                 p["w_ih"], p["b"])
        gates = gates.reshape(T_, B_, 8 * H)
        if layer < num_layers - 1:
            layer_in = bilstm_recurrence_seq(gates, p["w_hh_f"], p["w_hh_b"], H)
        else:
            w_fc, b_fc = params["fc"]
            logits = bilstm_recurrence_fc(gates, p["w_hh_f"], p["w_hh_b"],
                                          w_fc, b_fc, H, num_classes)
    return logits[:B0]


# --------------------------------------------------------------------------
# Pure-JAX reference (same math, same bf16 weights, no Pallas)
# --------------------------------------------------------------------------
def _ref_direction(gates_dir, w_hh, H):
    def step(carry, g_t):
        h, c = carry
        g = g_t + jnp.dot(h.astype(w_hh.dtype), w_hh,
                          preferred_element_type=jnp.float32)
        i_g = jax.nn.sigmoid(g[:, 0 * H:1 * H])
        f_g = jax.nn.sigmoid(g[:, 1 * H:2 * H])
        g_g = jnp.tanh(g[:, 2 * H:3 * H])
        o_g = jax.nn.sigmoid(g[:, 3 * H:4 * H])
        c = f_g * c + i_g * g_g
        h = o_g * jnp.tanh(c)
        return (h, c), h

    B = gates_dir.shape[1]
    h0 = jnp.zeros((B, H), jnp.float32)
    _, hs = lax.scan(step, (h0, h0), gates_dir)
    return hs


def bilstm_reference(x, params, hidden_size, num_layers):
    H = hidden_size
    layer_in = jnp.transpose(x, (1, 0, 2)).astype(jnp.bfloat16)
    layer_out = None
    for layer in range(num_layers):
        p = params["lstm"][layer]
        T, B, D = layer_in.shape
        gates = (jnp.dot(layer_in.reshape(T * B, D), p["w_ih"],
                         preferred_element_type=jnp.float32)
                 .reshape(T, B, 8 * H) + p["b"])
        out_f = _ref_direction(gates[:, :, :4 * H], p["w_hh_f"], H)
        out_b = jnp.flip(
            _ref_direction(jnp.flip(gates[:, :, 4 * H:], axis=0),
                           p["w_hh_b"], H), axis=0)
        layer_out = jnp.concatenate([out_f, out_b], axis=-1)    # f32
        layer_in = layer_out.astype(jnp.bfloat16)
    w_fc, b_fc = params["fc"]
    return (jnp.dot(layer_out[-1], w_fc,
                    preferred_element_type=jnp.float32) + b_fc)


# --------------------------------------------------------------------------
if __name__ == "__main__":
    batch = 2
    seq_len = 8
    input_size = 16
    hidden_size = 32
    num_layers = 2
    num_classes = 4

    key = jax.random.PRNGKey(0)
    key, xkey = jax.random.split(key)
    x = jax.random.normal(xkey, (batch, seq_len, input_size), jnp.float32)

    params = init_params(key, input_size, hidden_size, num_layers, num_classes)

    out = jax.block_until_ready(
        bilstm_forward(x, params, hidden_size, num_layers, num_classes))
    ref = jax.block_until_ready(
        bilstm_reference(x, params, hidden_size, num_layers))

    assert out.shape == (batch, num_classes), out.shape
    max_err = float(jnp.max(jnp.abs(out - ref)))
    assert jnp.allclose(out, ref, atol=5e-3, rtol=5e-3), max_err

    print("KERNEL_OK")
</pallas_src>

<mosaic_0001>
module attributes {stable_mosaic.version = 11 : i64} {
  func.func @_proj_kernel(%arg0: i32, %arg1: memref<64x16xbf16, #tpu.memory_space<vmem>>, %arg2: memref<16x256xbf16, #tpu.memory_space<vmem>>, %arg3: memref<1x256xf32, #tpu.memory_space<vmem>>, %arg4: memref<64x256xf32, #tpu.memory_space<vmem>>) attributes {dimension_semantics = [#tpu.dimension_semantics<parallel>], iteration_bounds = array<i64: 1>, scalar_prefetch = 0 : i64, scratch_operands = 0 : i64, tpu.core_type = #tpu.core_type<tc>, window_params = [{transform_indices = @transform_0, window_bounds = array<i64: 64, 16>}, {pipeline_mode = #tpu.pipeline_mode<synchronous>, transform_indices = @transform_1, window_bounds = array<i64: 16, 256>}, {pipeline_mode = #tpu.pipeline_mode<synchronous>, transform_indices = @transform_2, window_bounds = array<i64: 1, 256>}, {transform_indices = @transform_3, window_bounds = array<i64: 64, 256>}]} {
    %c0 = arith.constant 0 : index
    %c0_0 = arith.constant 0 : index
    %0 = vector.load %arg1[%c0, %c0_0] : memref<64x16xbf16, #tpu.memory_space<vmem>>, vector<64x16xbf16>
    %c0_1 = arith.constant 0 : index
    %c0_2 = arith.constant 0 : index
    %1 = vector.load %arg2[%c0_1, %c0_2] : memref<16x256xbf16, #tpu.memory_space<vmem>>, vector<16x256xbf16>
    %cst = arith.constant dense<0.000000e+00> : vector<64x256xf32>
    %2 = tpu.matmul %0, %1, %cst {dimension_numbers = #tpu.dot_dimension_numbers<[1], [0], [0], [1], [0, 0, 1, 1], [], []>} : vector<64x16xbf16>, vector<16x256xbf16>, vector<64x256xf32> -> vector<64x256xf32>
    %c0_3 = arith.constant 0 : index
    %c0_4 = arith.constant 0 : index
    %3 = vector.load %arg3[%c0_3, %c0_4] : memref<1x256xf32, #tpu.memory_space<vmem>>, vector<1x256xf32>
    %4 = vector.broadcast %3 : vector<1x256xf32> to vector<64x256xf32>
    %5 = arith.addf %2, %4 : vector<64x256xf32>
    %c0_5 = arith.constant 0 : index
    %c0_6 = arith.constant 0 : index
    %6 = vector.load %arg4[%c0_5, %c0_6] : memref<64x256xf32, #tpu.memory_space<vmem>>, vector<64x256xf32>
    tpu.vector_store %arg4[%c0_5, %c0_6], %5 {strides = array<i32>} : memref<64x256xf32, #tpu.memory_space<vmem>>, vector<64x256xf32>,
    return
  }
  func.func @transform_0(%arg0: i32) -> (i32, i32) {
    %c0_i32 = arith.constant 0 : i32
    %c0_i32_0 = arith.constant 0 : i32
    return %arg0, %c0_i32 : i32, i32
  }
  func.func @transform_1(%arg0: i32) -> (i32, i32) {
    %c0_i32 = arith.constant 0 : i32
    %c0_i32_0 = arith.constant 0 : i32
    %c0_i32_1 = arith.constant 0 : i32
    return %c0_i32, %c0_i32_0 : i32, i32
  }
  func.func @transform_2(%arg0: i32) -> (i32, i32) {
    %c0_i32 = arith.constant 0 : i32
    %c0_i32_0 = arith.constant 0 : i32
    %c0_i32_1 = arith.constant 0 : i32
    return %c0_i32, %c0_i32_0 : i32, i32
  }
  func.func @transform_3(%arg0: i32) -> (i32, i32) {
    %c0_i32 = arith.constant 0 : i32
    %c0_i32_0 = arith.constant 0 : i32
    return %arg0, %c0_i32 : i32, i32
  }
}

</mosaic_0001>

<bundles_post_ra>
// kernel: tpu_custom_call.1
= control target key start
LH: loop header
LB: loop body
LE: loop exit
PB: predicated region body
PF: predicated region fallthrough
CT: control target
= control target key end

     0   :  { %v233_v2 = vmov 0   ;;  %vm68_vm0 = vcmask 130048   ;;  %s290_s0 = inlined_call_operand.vmem [shape: bf16[64,16], index: 0, kind: input, shape index: {}]   ;;  %s291_s1 = inlined_call_operand.vmem [shape: bf16[16,256], index: 1, kind: input, shape index: {}]   ;;  %s292_s2 = inlined_call_operand.vmem [shape: f32[1,256], index: 2, kind: input, shape index: {}]   ;;  %s293_s3 = inlined_call_operand.hbm [shape: f32[64,256], index: 3, kind: output, shape index: {}]  }
   0x1   :  { %v202_v0 = vld [vmem:[%s291_s1 + $0x4] ss:$8 sps:$4 sm:$0xff]   ;;  %v204_v1 = vld [vmem:[%s291_s1] ss:$8 sps:$4 sm:$0xff]   ;;  %113 = vmatprep.mubr.bf16.mxu0 %v233_v2  ;;  %133 = vmatprep.mubr.bf16.mxu1 %v233_v2  ;;  %v206_v4 = vld [vmem:[%s290_s0 + $0x10] sm:$0xff]  }
   0x2   :  { %81 = vmatprep.subr.bf16.mxu0 %v202_v0  ;;  %196 = vmatprep.subr.bf16.mxu1 %v202_v0  ;;  %v205_v3 = vld [vmem:[%s290_s0] sm:$0xff]  }
   0x3   :  { %82 = vmatpush1.bf16.msra.mxu0 %v204_v1  ;;  %197 = vmatpush1.bf16.msra.mxu1 %v204_v1 }
   0x4   :  { %8 = vsyncpa [#allocation3], 0  ;;  %v207_v5 = vld [vmem:[%s290_s0 + $0x8] sm:$0xff]   ;;  %v208_v6 = vld [vmem:[%s290_s0 + $0x18] sm:$0xff]   ;;  %v28_v7 = vlaneseq  ;;  %s234_s0 = smov [#allocation2]  }
   0x5   :  { %v26_v10 = vld [vmem:[%s292_s2] sm:$0x3]  ;;  %s175_s2 = sshll.u32 %s234_s0, 4  ;;  %s176_s2 = int_to_ptr.vmem [resolvable:$true] %s175_s2 }
   0x6   :  { %192 = vmatmul.mubr.msk.bf16.vlgmr.msra.gmra.mrb[0].mxu0 %vm68_vm0, %v205_v3  ;;  %194 = vmatmul.mubr.msk.bf16.vlgmr.msra.gmra.mrb[0].mxu1 %vm68_vm0, %v206_v4  ;;  %v29_v8 = vshrl.u32 %v28_v7, 7  ;;  %s209_s25 = scalar_lea.vmem %s176_s2, 2048  ;;  %p214_p1 = scmp.lt.s32.totalorder %s176_s2, %s176_s2 }
   0x7   :  { %123 = vmatprep.mubr.bf16.mxu0 %v233_v2  ;;  %143 = vmatprep.mubr.bf16.mxu1 %v233_v2  ;;  %p210_p0 = scmp.ne.s32.totalorder %s176_s2, %s209_s25  ;;  %p215_p2 = scmp.lt.s32.totalorder %s209_s25, %s209_s25 }
   0x8   :  { %v30_v9 = vsub.s32 0, %v29_v8  ;;  %v34_v11 = vsub.s32 1, %v29_v8 }
   0x9   :  { %p216_p3 = por %p215_p2, %p214_p1 }
   0xa   :  { %v31_v12 = vrot.slane %v26_v10, %v30_v9  ;;  %v35_v13 = vrot.slane %v26_v10, %v34_v11 }
   0xb   :  { %p217_p4 = pnand %p216_p3, %p210_p0 }
   0xe   :  { %193 = vmatmul.mubr.msk.bf16.gmra.mrb[4].mxu0 %vm68_vm0, %v207_v5  ;;  %195 = vmatmul.mubr.msk.bf16.gmra.mrb[4].mxu1 %vm68_vm0, %v208_v6 }
  0xd9   :  { %v115_v14 = vpop.f32.mrb[0].mxu0  ;;  %v135_v15 = vpop.f32.mrb[0].mxu1 }
  0xda   :  { %v116_v16 = vadd.f32 %v115_v14, %v31_v12  ;;  %v136_v17 = vadd.f32 %v135_v15, %v31_v12  ;;  %v117_v18 = vpop.f32.mrb[1].mxu0  ;;  %v137_v19 = vpop.f32.mrb[1].mxu1 }
  0xdb   :  { %v118_v20 = vadd.f32 %v117_v18, %v35_v13  ;;  %v138_v21 = vadd.f32 %v137_v19, %v35_v13  ;;  %v119_v22 = vpop.f32.mrb[2].mxu0  ;;  %v139_v23 = vpop.f32.mrb[2].mxu1 }
  0xdc   :  { %154 = vst [vmem:[#allocation2] sm:$0xff] %v116_v16  ;;  %162 = vst [vmem:[#allocation2 + $0x40] sm:$0xff] %v136_v17  ;;  %v120_v24 = vadd.f32 %v119_v22, %v31_v12  ;;  %v140_v25 = vadd.f32 %v139_v23, %v31_v12  ;;  %v121_v26 = vpop.f32.mrb[3].mxu0  ;;  %v141_v27 = vpop.f32.mrb[3].mxu1 }
  0xdd   :  { %155 = vst [vmem:[#allocation2 + $0x8] sm:$0xff] %v118_v20  ;;  %163 = vst [vmem:[#allocation2 + $0x48] sm:$0xff] %v138_v21  ;;  %v122_v28 = vadd.f32 %v121_v26, %v35_v13  ;;  %v142_v29 = vadd.f32 %v141_v27, %v35_v13 }
  0xde   :  { %156 = vst [vmem:[#allocation2 + $0x10] sm:$0xff] %v120_v24  ;;  %164 = vst [vmem:[#allocation2 + $0x50] sm:$0xff] %v140_v25 }
  0xdf   :  { %157 = vst [vmem:[#allocation2 + $0x18] sm:$0xff] %v122_v28  ;;  %165 = vst [vmem:[#allocation2 + $0x58] sm:$0xff] %v142_v29 }
  0xe1   :  { %v125_v30 = vpop.f32.mrb[4].mxu0  ;;  %v145_v31 = vpop.f32.mrb[4].mxu1 }
  0xe2   :  { %v126_v32 = vadd.f32 %v125_v30, %v31_v12  ;;  %v146_v33 = vadd.f32 %v145_v31, %v31_v12  ;;  %v127_v34 = vpop.f32.mrb[5].mxu0  ;;  %v147_v35 = vpop.f32.mrb[5].mxu1 }
  0xe3   :  { %v128_v36 = vadd.f32 %v127_v34, %v35_v13  ;;  %v148_v37 = vadd.f32 %v147_v35, %v35_v13  ;;  %v129_v38 = vpop.f32.mrb[6].mxu0  ;;  %v149_v39 = vpop.f32.mrb[6].mxu1 }
  0xe4   :  { %158 = vst [vmem:[#allocation2 + $0x20] sm:$0xff] %v126_v32  ;;  %166 = vst [vmem:[#allocation2 + $0x60] sm:$0xff] %v146_v33  ;;  %v130_v40 = vadd.f32 %v129_v38, %v31_v12  ;;  %v150_v41 = vadd.f32 %v149_v39, %v31_v12  ;;  %v131_v42 = vpop.f32.mrb[7].mxu0  ;;  %v151_v43 = vpop.f32.mrb[7].mxu1 }
  0xe5   :  { %159 = vst [vmem:[#allocation2 + $0x28] sm:$0xff] %v128_v36  ;;  %167 = vst [vmem:[#allocation2 + $0x68] sm:$0xff] %v148_v37  ;;  %v132_v44 = vadd.f32 %v131_v42, %v35_v13  ;;  %v152_v45 = vadd.f32 %v151_v43, %v35_v13 }
  0xe6   :  { %160 = vst [vmem:[#allocation2 + $0x30] sm:$0xff] %v130_v40  ;;  %168 = vst [vmem:[#allocation2 + $0x70] sm:$0xff] %v150_v41 }
  0xe7   :  { %161 = vst [vmem:[#allocation2 + $0x38] sm:$0xff] %v132_v44  ;;  %169 = vst [vmem:[#allocation2 + $0x78] sm:$0xff] %v152_v45 }
  0xe8   :  { %220 = shalt.err (!%p217_p4)
}
  0xe9   :  { %s221_s28 = scalar_lea.hbm %s293_s3, 2048 }
  0xea   :  { %p222_p5 = scmp.ne.s32.totalorder %s293_s3, %s221_s28  ;;  %p225_p6 = scmp.lt.u32.totalorder %s221_s28, %s293_s3 }
  0xec   :  { %p227_p7 = pnand %p225_p6, %p222_p5 }
  0xee   :  { %230 = shalt.err (!%p227_p7)
}
  0xef   :  { %s235_s6 = smov 256   ;;  %s236_s7 = smov 16  }
  0xf0   :  { %181 = dma.vmem_to_hbm [thread:$0]  %s176_s2, 2048, %s293_s3, [#allocation3], %s235_s6, %s235_s6, %s236_s7  }
  0xf1   :  { %231 = dma.done.wait [#allocation3], 2048  }
  0xf2   :  { %232 = vsyncadd [#allocation3], 4294965248 }
  0xf3   :  { %185 = vsyncpa [#allocation3], 1 }

</bundles_post_ra>
